<compile_context>
chip_gen: v6e
topology: v6e:2x2x1
jax: 0.10.0
libtpu: 0.0.40
codegen_flags: <defaults>
</compile_context>

<pallas_src>
import jax
import jax.numpy as jnp
from jax import lax
from jax.experimental import pallas as pl
from jax.experimental.pallas import tpu as pltpu  # noqa: F401  (not needed at this size)

_CPAD = 16  # channels padded to a multiple of 8 (f32 sublane tile)


def _make_fused_kernel(B, C, L, K1, K2):
    """Builds the fused conv1d(K1,'same') -> conv1d(K2,'same') kernel body."""

    def conv_same(xc, w, bias, K):
        # xc:   (CPAD, B*L) activation slab (padded channel rows already zero)
        # w:    (CPAD, K*CPAD) flattened weights (zero rows/cols for padding)
        # bias: (CPAD, 1)
        pad = (K - 1) // 2
        z = jnp.zeros((_CPAD, pad), jnp.float32)
        # Per-batch spatially padded segments -- value-level, no VMEM scratch.
        segs = [
            jnp.concatenate([z, xc[:, b * L:(b + 1) * L], z], axis=1)
            for b in range(B)
        ]
        # im2col slab: slab[k*CPAD + c, b*L + l] == xpad[b, c, l + k].
        # Every k-piece is a full 16-row block, so the axis-0 concat is
        # sublane-aligned (cheap vreg stacking, off the MXU path).
        slab = jnp.concatenate(
            [
                jnp.concatenate([s[:, k:k + L] for s in segs], axis=1)
                for k in range(K)
            ],
            axis=0,
        )
        return jnp.dot(w, slab, preferred_element_type=jnp.float32) + bias

    def kernel(x_ref, w1_ref, b1_ref, w2_ref, b2_ref, o_ref):
        # Zero-pad input channels C -> CPAD once (value-level concat).
        x = jnp.concatenate(
            [x_ref[...], jnp.zeros((_CPAD - C, B * L), jnp.float32)], axis=0)
        # Layer 1; result stays in registers (never touches HBM or scratch).
        y1 = conv_same(x, w1_ref[...], b1_ref[...], K1)
        # Layer 2; single lane-dense store of the (16, B*L) result slab.
        o_ref[...] = conv_same(y1, w2_ref[...], b2_ref[...], K2)

    return kernel


def prepare_params(params):
    """One-time re-layout of torch-style Conv1d params into kernel layout.

    weight (Cout, Cin, K) -> (CPAD, K*CPAD) with column index k*CPAD + ci,
    zero for ci >= Cin and for rows co >= Cout; bias (Cout,) -> (CPAD, 1).
    Hoisted out of the per-call forward path.
    """
    w1, b1, w2, b2 = params
    prepared = []
    for w, b in ((w1, b1), (w2, b2)):
        Cout, Cin, K = w.shape
        assert K % 2 == 1, "padding=(K-1)//2 matches PyTorch only for odd K"
        assert Cin <= _CPAD and Cout <= _CPAD
        wp = jnp.zeros((_CPAD, _CPAD, K), jnp.float32).at[:Cout, :Cin, :].set(
            w.astype(jnp.float32))
        wf = jnp.transpose(wp, (0, 2, 1)).reshape(_CPAD, K * _CPAD)
        bp = jnp.zeros((_CPAD, 1), jnp.float32).at[:Cout, 0].set(
            b.astype(jnp.float32))
        prepared += [wf, bp]
    return tuple(prepared)


def child_net_forward(x, prepared):
    """ChildNet.forward (conv1 -> conv2) as a single fused Pallas call."""
    w1f, b1, w2f, b2 = prepared
    B, C, L = x.shape
    K1 = w1f.shape[1] // _CPAD
    K2 = w2f.shape[1] // _CPAD

    # Lane-dense (C, B*L) input slab; layout plumbing stays outside the kernel.
    x2d = jnp.transpose(x, (1, 0, 2)).reshape(C, B * L)

    kernel = _make_fused_kernel(B, C, L, K1, K2)

    out2d = pl.pallas_call(
        kernel,
        out_shape=jax.ShapeDtypeStruct((_CPAD, B * L), jnp.float32),
        grid=(1,),
        in_specs=[
            pl.BlockSpec((C, B * L), lambda i: (0, 0)),
            pl.BlockSpec(w1f.shape, lambda i: (0, 0)),
            pl.BlockSpec(b1.shape, lambda i: (0, 0)),
            pl.BlockSpec(w2f.shape, lambda i: (0, 0)),
            pl.BlockSpec(b2.shape, lambda i: (0, 0)),
        ],
        out_specs=pl.BlockSpec((_CPAD, B * L), lambda i: (0, 0)),
    )(x2d, w1f, b1, w2f, b2)

    # (CPAD, B*L) slab -> (B, C, L); trims the padded output rows.
    return jnp.transpose(out2d[:C].reshape(C, B, L), (1, 0, 2))


def init_params(key):
    """Deterministic parameter init (shapes match nn.Conv1d(10, 10, k))."""
    k1, k2, k3, k4 = jax.random.split(key, 4)
    # conv1: Conv1d(10, 10, 5, padding=2)
    w1 = jax.random.normal(k1, (10, 10, 5), jnp.float32) * 0.1
    b1 = jax.random.normal(k2, (10,), jnp.float32) * 0.1
    # conv2: Conv1d(10, 10, 15, padding=7)
    w2 = jax.random.normal(k3, (10, 10, 15), jnp.float32) * 0.05
    b2 = jax.random.normal(k4, (10,), jnp.float32) * 0.1
    return (w1, b1, w2, b2)


def _ref_conv1d_same(x, w, b):
    """Plain-JAX reference (correctness sanity check)."""
    pad = (w.shape[-1] - 1) // 2
    y = lax.conv_general_dilated(
        x, w, window_strides=(1,), padding=[(pad, pad)],
        dimension_numbers=("NCH", "OIH", "NCH"))
    return y + b[None, :, None]


if __name__ == "__main__":
    key = jax.random.PRNGKey(0)
    pkey, xkey = jax.random.split(key)
    params = init_params(pkey)
    prepared = prepare_params(params)   # one-time weight/bias re-layout

    # Input consistent with the module: (batch=2, channels=10, length=16).
    x = jax.random.normal(xkey, (2, 10, 16), jnp.float32)

    fwd = jax.jit(child_net_forward)
    out = jax.block_until_ready(fwd(x, prepared))

    ref = _ref_conv1d_same(_ref_conv1d_same(x, params[0], params[1]),
                           params[2], params[3])
    assert out.shape == (2, 10, 16)
    assert jnp.allclose(out, ref, atol=1e-4, rtol=1e-4)

    print("KERNEL_OK")
</pallas_src>

<mosaic_0001>
module attributes {stable_mosaic.version = 11 : i64} {
  func.func @kernel(%arg0: i32, %arg1: memref<10x32xf32, #tpu.memory_space<vmem>>, %arg2: memref<16x80xf32, #tpu.memory_space<vmem>>, %arg3: memref<16x1xf32, #tpu.memory_space<vmem>>, %arg4: memref<16x240xf32, #tpu.memory_space<vmem>>, %arg5: memref<16x1xf32, #tpu.memory_space<vmem>>, %arg6: memref<16x32xf32, #tpu.memory_space<vmem>>) attributes {dimension_semantics = [#tpu.dimension_semantics<arbitrary>], iteration_bounds = array<i64: 1>, scalar_prefetch = 0 : i64, scratch_operands = 0 : i64, tpu.core_type = #tpu.core_type<tc>, window_params = [{pipeline_mode = #tpu.pipeline_mode<synchronous>, transform_indices = @transform_0, window_bounds = array<i64: 10, 32>}, {pipeline_mode = #tpu.pipeline_mode<synchronous>, transform_indices = @transform_1, window_bounds = array<i64: 16, 80>}, {pipeline_mode = #tpu.pipeline_mode<synchronous>, transform_indices = @transform_2, window_bounds = array<i64: 16, 1>}, {pipeline_mode = #tpu.pipeline_mode<synchronous>, transform_indices = @transform_3, window_bounds = array<i64: 16, 240>}, {pipeline_mode = #tpu.pipeline_mode<synchronous>, transform_indices = @transform_4, window_bounds = array<i64: 16, 1>}, {pipeline_mode = #tpu.pipeline_mode<synchronous>, transform_indices = @transform_5, window_bounds = array<i64: 16, 32>}]} {
    %c0 = arith.constant 0 : index
    %c0_0 = arith.constant 0 : index
    %0 = vector.load %arg1[%c0, %c0_0] : memref<10x32xf32, #tpu.memory_space<vmem>>, vector<10x32xf32>
    %cst = arith.constant 0.000000e+00 : f32
    %1 = vector.broadcast %cst : f32 to vector<6x32xf32>
    %2 = tpu.concatenate %0, %1 in 0 : vector<10x32xf32>, vector<6x32xf32> -> vector<16x32xf32>
    %c0_1 = arith.constant 0 : index
    %c0_2 = arith.constant 0 : index
    %3 = vector.load %arg2[%c0_1, %c0_2] : memref<16x80xf32, #tpu.memory_space<vmem>>, vector<16x80xf32>
    %c0_3 = arith.constant 0 : index
    %c0_4 = arith.constant 0 : index
    %4 = vector.load %arg3[%c0_3, %c0_4] : memref<16x1xf32, #tpu.memory_space<vmem>>, vector<16x1xf32>
    %cst_5 = arith.constant 0.000000e+00 : f32
    %5 = vector.broadcast %cst_5 : f32 to vector<16x2xf32>
    %6 = vector.extract_strided_slice %2 {offsets = [0, 0], sizes = [16, 16], strides = [1, 1]} : vector<16x32xf32> to vector<16x16xf32>
    %7 = tpu.concatenate %5, %6, %5 in 1 : vector<16x2xf32>, vector<16x16xf32>, vector<16x2xf32> -> vector<16x20xf32>
    %8 = vector.extract_strided_slice %2 {offsets = [0, 16], sizes = [16, 16], strides = [1, 1]} : vector<16x32xf32> to vector<16x16xf32>
    %9 = tpu.concatenate %5, %8, %5 in 1 : vector<16x2xf32>, vector<16x16xf32>, vector<16x2xf32> -> vector<16x20xf32>
    %10 = vector.extract_strided_slice %7 {offsets = [0, 0], sizes = [16, 16], strides = [1, 1]} : vector<16x20xf32> to vector<16x16xf32>
    %11 = vector.extract_strided_slice %9 {offsets = [0, 0], sizes = [16, 16], strides = [1, 1]} : vector<16x20xf32> to vector<16x16xf32>
    %12 = tpu.concatenate %10, %11 in 1 : vector<16x16xf32>, vector<16x16xf32> -> vector<16x32xf32>
    %13 = vector.extract_strided_slice %7 {offsets = [0, 1], sizes = [16, 16], strides = [1, 1]} : vector<16x20xf32> to vector<16x16xf32>
    %14 = vector.extract_strided_slice %9 {offsets = [0, 1], sizes = [16, 16], strides = [1, 1]} : vector<16x20xf32> to vector<16x16xf32>
    %15 = tpu.concatenate %13, %14 in 1 : vector<16x16xf32>, vector<16x16xf32> -> vector<16x32xf32>
    %16 = vector.extract_strided_slice %7 {offsets = [0, 2], sizes = [16, 16], strides = [1, 1]} : vector<16x20xf32> to vector<16x16xf32>
    %17 = vector.extract_strided_slice %9 {offsets = [0, 2], sizes = [16, 16], strides = [1, 1]} : vector<16x20xf32> to vector<16x16xf32>
    %18 = tpu.concatenate %16, %17 in 1 : vector<16x16xf32>, vector<16x16xf32> -> vector<16x32xf32>
    %19 = vector.extract_strided_slice %7 {offsets = [0, 3], sizes = [16, 16], strides = [1, 1]} : vector<16x20xf32> to vector<16x16xf32>
    %20 = vector.extract_strided_slice %9 {offsets = [0, 3], sizes = [16, 16], strides = [1, 1]} : vector<16x20xf32> to vector<16x16xf32>
    %21 = tpu.concatenate %19, %20 in 1 : vector<16x16xf32>, vector<16x16xf32> -> vector<16x32xf32>
    %22 = vector.extract_strided_slice %7 {offsets = [0, 4], sizes = [16, 16], strides = [1, 1]} : vector<16x20xf32> to vector<16x16xf32>
    %23 = vector.extract_strided_slice %9 {offsets = [0, 4], sizes = [16, 16], strides = [1, 1]} : vector<16x20xf32> to vector<16x16xf32>
    %24 = tpu.concatenate %22, %23 in 1 : vector<16x16xf32>, vector<16x16xf32> -> vector<16x32xf32>
    %25 = tpu.concatenate %12, %15, %18, %21, %24 in 0 : vector<16x32xf32>, vector<16x32xf32>, vector<16x32xf32>, vector<16x32xf32>, vector<16x32xf32> -> vector<80x32xf32>
    %cst_6 = arith.constant dense<0.000000e+00> : vector<16x32xf32>
    %26 = tpu.matmul %3, %25, %cst_6 {dimension_numbers = #tpu.dot_dimension_numbers<[1], [0], [0], [1], [0, 0, 1, 1], [], []>} : vector<16x80xf32>, vector<80x32xf32>, vector<16x32xf32> -> vector<16x32xf32>
    %27 = vector.broadcast %4 : vector<16x1xf32> to vector<16x32xf32>
    %28 = arith.addf %26, %27 : vector<16x32xf32>
    %c0_7 = arith.constant 0 : index
    %c0_8 = arith.constant 0 : index
    %29 = vector.load %arg4[%c0_7, %c0_8] : memref<16x240xf32, #tpu.memory_space<vmem>>, vector<16x240xf32>
    %c0_9 = arith.constant 0 : index
    %c0_10 = arith.constant 0 : index
    %30 = vector.load %arg5[%c0_9, %c0_10] : memref<16x1xf32, #tpu.memory_space<vmem>>, vector<16x1xf32>
    %cst_11 = arith.constant 0.000000e+00 : f32
    %31 = vector.broadcast %cst_11 : f32 to vector<16x7xf32>
    %32 = vector.extract_strided_slice %28 {offsets = [0, 0], sizes = [16, 16], strides = [1, 1]} : vector<16x32xf32> to vector<16x16xf32>
    %33 = tpu.concatenate %31, %32, %31 in 1 : vector<16x7xf32>, vector<16x16xf32>, vector<16x7xf32> -> vector<16x30xf32>
    %34 = vector.extract_strided_slice %28 {offsets = [0, 16], sizes = [16, 16], strides = [1, 1]} : vector<16x32xf32> to vector<16x16xf32>
    %35 = tpu.concatenate %31, %34, %31 in 1 : vector<16x7xf32>, vector<16x16xf32>, vector<16x7xf32> -> vector<16x30xf32>
    %36 = vector.extract_strided_slice %33 {offsets = [0, 0], sizes = [16, 16], strides = [1, 1]} : vector<16x30xf32> to vector<16x16xf32>
    %37 = vector.extract_strided_slice %35 {offsets = [0, 0], sizes = [16, 16], strides = [1, 1]} : vector<16x30xf32> to vector<16x16xf32>
    %38 = tpu.concatenate %36, %37 in 1 : vector<16x16xf32>, vector<16x16xf32> -> vector<16x32xf32>
    %39 = vector.extract_strided_slice %33 {offsets = [0, 1], sizes = [16, 16], strides = [1, 1]} : vector<16x30xf32> to vector<16x16xf32>
    %40 = vector.extract_strided_slice %35 {offsets = [0, 1], sizes = [16, 16], strides = [1, 1]} : vector<16x30xf32> to vector<16x16xf32>
    %41 = tpu.concatenate %39, %40 in 1 : vector<16x16xf32>, vector<16x16xf32> -> vector<16x32xf32>
    %42 = vector.extract_strided_slice %33 {offsets = [0, 2], sizes = [16, 16], strides = [1, 1]} : vector<16x30xf32> to vector<16x16xf32>
    %43 = vector.extract_strided_slice %35 {offsets = [0, 2], sizes = [16, 16], strides = [1, 1]} : vector<16x30xf32> to vector<16x16xf32>
    %44 = tpu.concatenate %42, %43 in 1 : vector<16x16xf32>, vector<16x16xf32> -> vector<16x32xf32>
    %45 = vector.extract_strided_slice %33 {offsets = [0, 3], sizes = [16, 16], strides = [1, 1]} : vector<16x30xf32> to vector<16x16xf32>
    %46 = vector.extract_strided_slice %35 {offsets = [0, 3], sizes = [16, 16], strides = [1, 1]} : vector<16x30xf32> to vector<16x16xf32>
    %47 = tpu.concatenate %45, %46 in 1 : vector<16x16xf32>, vector<16x16xf32> -> vector<16x32xf32>
    %48 = vector.extract_strided_slice %33 {offsets = [0, 4], sizes = [16, 16], strides = [1, 1]} : vector<16x30xf32> to vector<16x16xf32>
    %49 = vector.extract_strided_slice %35 {offsets = [0, 4], sizes = [16, 16], strides = [1, 1]} : vector<16x30xf32> to vector<16x16xf32>
    %50 = tpu.concatenate %48, %49 in 1 : vector<16x16xf32>, vector<16x16xf32> -> vector<16x32xf32>
    %51 = vector.extract_strided_slice %33 {offsets = [0, 5], sizes = [16, 16], strides = [1, 1]} : vector<16x30xf32> to vector<16x16xf32>
    %52 = vector.extract_strided_slice %35 {offsets = [0, 5], sizes = [16, 16], strides = [1, 1]} : vector<16x30xf32> to vector<16x16xf32>
    %53 = tpu.concatenate %51, %52 in 1 : vector<16x16xf32>, vector<16x16xf32> -> vector<16x32xf32>
    %54 = vector.extract_strided_slice %33 {offsets = [0, 6], sizes = [16, 16], strides = [1, 1]} : vector<16x30xf32> to vector<16x16xf32>
    %55 = vector.extract_strided_slice %35 {offsets = [0, 6], sizes = [16, 16], strides = [1, 1]} : vector<16x30xf32> to vector<16x16xf32>
    %56 = tpu.concatenate %54, %55 in 1 : vector<16x16xf32>, vector<16x16xf32> -> vector<16x32xf32>
    %57 = vector.extract_strided_slice %33 {offsets = [0, 7], sizes = [16, 16], strides = [1, 1]} : vector<16x30xf32> to vector<16x16xf32>
    %58 = vector.extract_strided_slice %35 {offsets = [0, 7], sizes = [16, 16], strides = [1, 1]} : vector<16x30xf32> to vector<16x16xf32>
    %59 = tpu.concatenate %57, %58 in 1 : vector<16x16xf32>, vector<16x16xf32> -> vector<16x32xf32>
    %60 = vector.extract_strided_slice %33 {offsets = [0, 8], sizes = [16, 16], strides = [1, 1]} : vector<16x30xf32> to vector<16x16xf32>
    %61 = vector.extract_strided_slice %35 {offsets = [0, 8], sizes = [16, 16], strides = [1, 1]} : vector<16x30xf32> to vector<16x16xf32>
    %62 = tpu.concatenate %60, %61 in 1 : vector<16x16xf32>, vector<16x16xf32> -> vector<16x32xf32>
    %63 = vector.extract_strided_slice %33 {offsets = [0, 9], sizes = [16, 16], strides = [1, 1]} : vector<16x30xf32> to vector<16x16xf32>
    %64 = vector.extract_strided_slice %35 {offsets = [0, 9], sizes = [16, 16], strides = [1, 1]} : vector<16x30xf32> to vector<16x16xf32>
    %65 = tpu.concatenate %63, %64 in 1 : vector<16x16xf32>, vector<16x16xf32> -> vector<16x32xf32>
    %66 = vector.extract_strided_slice %33 {offsets = [0, 10], sizes = [16, 16], strides = [1, 1]} : vector<16x30xf32> to vector<16x16xf32>
    %67 = vector.extract_strided_slice %35 {offsets = [0, 10], sizes = [16, 16], strides = [1, 1]} : vector<16x30xf32> to vector<16x16xf32>
    %68 = tpu.concatenate %66, %67 in 1 : vector<16x16xf32>, vector<16x16xf32> -> vector<16x32xf32>
    %69 = vector.extract_strided_slice %33 {offsets = [0, 11], sizes = [16, 16], strides = [1, 1]} : vector<16x30xf32> to vector<16x16xf32>
    %70 = vector.extract_strided_slice %35 {offsets = [0, 11], sizes = [16, 16], strides = [1, 1]} : vector<16x30xf32> to vector<16x16xf32>
    %71 = tpu.concatenate %69, %70 in 1 : vector<16x16xf32>, vector<16x16xf32> -> vector<16x32xf32>
    %72 = vector.extract_strided_slice %33 {offsets = [0, 12], sizes = [16, 16], strides = [1, 1]} : vector<16x30xf32> to vector<16x16xf32>
    %73 = vector.extract_strided_slice %35 {offsets = [0, 12], sizes = [16, 16], strides = [1, 1]} : vector<16x30xf32> to vector<16x16xf32>
    %74 = tpu.concatenate %72, %73 in 1 : vector<16x16xf32>, vector<16x16xf32> -> vector<16x32xf32>
    %75 = vector.extract_strided_slice %33 {offsets = [0, 13], sizes = [16, 16], strides = [1, 1]} : vector<16x30xf32> to vector<16x16xf32>
    %76 = vector.extract_strided_slice %35 {offsets = [0, 13], sizes = [16, 16], strides = [1, 1]} : vector<16x30xf32> to vector<16x16xf32>
    %77 = tpu.concatenate %75, %76 in 1 : vector<16x16xf32>, vector<16x16xf32> -> vector<16x32xf32>
    %78 = vector.extract_strided_slice %33 {offsets = [0, 14], sizes = [16, 16], strides = [1, 1]} : vector<16x30xf32> to vector<16x16xf32>
    %79 = vector.extract_strided_slice %35 {offsets = [0, 14], sizes = [16, 16], strides = [1, 1]} : vector<16x30xf32> to vector<16x16xf32>
    %80 = tpu.concatenate %78, %79 in 1 : vector<16x16xf32>, vector<16x16xf32> -> vector<16x32xf32>
    %81 = tpu.concatenate %38, %41, %44, %47, %50, %53, %56, %59, %62, %65, %68, %71, %74, %77, %80 in 0 : vector<16x32xf32>, vector<16x32xf32>, vector<16x32xf32>, vector<16x32xf32>, vector<16x32xf32>, vector<16x32xf32>, vector<16x32xf32>, vector<16x32xf32>, vector<16x32xf32>, vector<16x32xf32>, vector<16x32xf32>, vector<16x32xf32>, vector<16x32xf32>, vector<16x32xf32>, vector<16x32xf32> -> vector<240x32xf32>
    %cst_12 = arith.constant dense<0.000000e+00> : vector<16x32xf32>
    %82 = tpu.matmul %29, %81, %cst_12 {dimension_numbers = #tpu.dot_dimension_numbers<[1], [0], [0], [1], [0, 0, 1, 1], [], []>} : vector<16x240xf32>, vector<240x32xf32>, vector<16x32xf32> -> vector<16x32xf32>
    %83 = vector.broadcast %30 : vector<16x1xf32> to vector<16x32xf32>
    %84 = arith.addf %82, %83 : vector<16x32xf32>
    %c0_13 = arith.constant 0 : index
    %c0_14 = arith.constant 0 : index
    %85 = vector.load %arg6[%c0_13, %c0_14] : memref<16x32xf32, #tpu.memory_space<vmem>>, vector<16x32xf32>
    tpu.vector_store %arg6[%c0_13, %c0_14], %84 {strides = array<i32>} : memref<16x32xf32, #tpu.memory_space<vmem>>, vector<16x32xf32>,
    return
  }
  func.func @transform_0(%arg0: i32) -> (i32, i32) {
    %c0_i32 = arith.constant 0 : i32
    %c0_i32_0 = arith.constant 0 : i32
    %c0_i32_1 = arith.constant 0 : i32
    return %c0_i32, %c0_i32_0 : i32, i32
  }
  func.func @transform_1(%arg0: i32) -> (i32, i32) {
    %c0_i32 = arith.constant 0 : i32
    %c0_i32_0 = arith.constant 0 : i32
    %c0_i32_1 = arith.constant 0 : i32
    return %c0_i32, %c0_i32_0 : i32, i32
  }
  func.func @transform_2(%arg0: i32) -> (i32, i32) {
    %c0_i32 = arith.constant 0 : i32
    %c0_i32_0 = arith.constant 0 : i32
    %c0_i32_1 = arith.constant 0 : i32
    return %c0_i32, %c0_i32_0 : i32, i32
  }
  func.func @transform_3(%arg0: i32) -> (i32, i32) {
    %c0_i32 = arith.constant 0 : i32
    %c0_i32_0 = arith.constant 0 : i32
    %c0_i32_1 = arith.constant 0 : i32
    return %c0_i32, %c0_i32_0 : i32, i32
  }
  func.func @transform_4(%arg0: i32) -> (i32, i32) {
    %c0_i32 = arith.constant 0 : i32
    %c0_i32_0 = arith.constant 0 : i32
    %c0_i32_1 = arith.constant 0 : i32
    return %c0_i32, %c0_i32_0 : i32, i32
  }
  func.func @transform_5(%arg0: i32) -> (i32, i32) {
    %c0_i32 = arith.constant 0 : i32
    %c0_i32_0 = arith.constant 0 : i32
    %c0_i32_1 = arith.constant 0 : i32
    return %c0_i32, %c0_i32_0 : i32, i32
  }
}

</mosaic_0001>

<bundles_post_ra>
// kernel: child_net_forward.1
= control target key start
LH: loop header
LB: loop body
LE: loop exit
PB: predicated region body
PF: predicated region fallthrough
CT: control target
= control target key end

     0   :  { %vm22_vm0 = vcmask 1041408   ;;  %s622_s22 = smov 2   ;;  %s623_s23 = smov 114   ;;  %vm36_vm1 = vcmask 15360   ;;  %vm39_vm2 = vcmask 146432   ;;  %vm131_vm3 = vcmask 654336   ;;  %s985_s0 = inlined_call_operand.vmem [shape: f32[10,32], index: 0, kind: input, shape index: {}]   ;;  %s986_s1 = inlined_call_operand.vmem [shape: f32[16,80], index: 1, kind: input, shape index: {}]   ;;  %s987_s2 = inlined_call_operand.vmem [shape: f32[16,1], index: 2, kind: input, shape index: {}]   ;;  %s988_s3 = inlined_call_operand.vmem [shape: f32[16,240], index: 3, kind: input, shape index: {}]   ;;  %s989_s4 = inlined_call_operand.vmem [shape: f32[16,1], index: 4, kind: input, shape index: {}]   ;;  %s990_s5 = inlined_call_operand.vmem [shape: f32[16,32], index: 5, kind: output, shape index: {}]  }
   0x1   :  { %v20_v0 = vld [vmem:[%s985_s0] sm:$0xff]  ;;  %v21_v1 = vld [vmem:[%s985_s0 + $0x8] sm:$0x3]  ;;  %s624_s0 = smov 124   ;;  %s625_s24 = smov 125   ;;  %v631_v16 = vmov 0  }
   0x2   :  { %30 = vrot.lane.b32.xlu1 %v20_v0, %s622_s22  ;;  %v23_v2 = vsel %vm22_vm0, %v21_v1, 0.0  ;;  %s626_s25 = smov 12   ;;  %s627_s26 = smov 126   ;;  %v24_v15 = vld [vmem:[%s986_s1] sm:$0xff]  ;;  %620 = vset.pattern.permute.xlu0 %v631_v16  ;;  %v27_v17 = vld [vmem:[%s987_s2 + $0x8] sm:$0xff]  ;;  %vm60_vm4 = vcmask 130048  }
   0x3   :  { %32 = vrot.lane.b32.xlu0 %v23_v2, %s622_s22  ;;  %s628_s27 = smov 13   ;;  %s629_s28 = smov 127   ;;  %586 = vmatprep.mubr.msk.f32.mxu0 %vm131_vm3, %v24_v15  ;;  %v26_v18 = vld [vmem:[%s987_s2] sm:$0xff]  ;;  %v25_v47 = vld [vmem:[%s986_s1 + $0x8] sm:$0xff]  ;;  %v636_v54 = vmov 0.0   ;;  %vm227_vm5 = vcmask 56320  }
   0x4   :  { %s630_s29 = smov 14   ;;  %621 = vset.pattern.permute.xlu1 %v631_v16  ;;  %s632_s7 = smov 15   ;;  %468 = vmatprep.subr.mxu1 %v636_v54  ;;  %vm230_vm6 = vcmask 187392   ;;  %vm461_vm7 = vcmask 916480   ;;  %vm543_vm8 = vcmask 261120  }
   0x5   :  { %s633_s8 = smov 16   ;;  %s634_s14 = smov 119  }
   0x6   :  { %42 = vrot.lane.b32.xlu1 %v20_v0, %s623_s23  ;;  %s635_s15 = smov 7   ;;  %s637_s1 = smov 9  }
   0x7   :  { %44 = vrot.lane.b32.xlu0 %v23_v2, %s623_s23  ;;  %s638_s16 = smov 121   ;;  %s639_s17 = smov 10  }
   0x8   :  { %s640_s18 = smov 122   ;;  %s641_s19 = smov 11  }
   0x9   :  { %s642_s20 = smov 123   ;;  %s643_s21 = smov 3  }
   0xa   :  { %s644_s30 = smov 4   ;;  %s645_s6 = smov 115  }
   0xb   :  { %s646_s9 = smov 5   ;;  %s647_s10 = smov 116  }
   0xc   :  { %s648_s11 = smov 6   ;;  %s649_s12 = smov 117  }
   0xd   :  { %s650_s2 = smov 118   ;;  %s651_s13 = smov 8  }
  0x74   :  { %v31_v3 = vpop.permute.xlu1 %30 }
  0x75   :  { %v37_v4 = vsel %vm36_vm1, 0.0, %v31_v3  ;;  %v33_v7 = vpop.permute.xlu0 %32  ;;  %v214_v3 = vld [vmem:[%s988_s3 + $0x8] sm:$0xff] }
  0x76   :  { %v695_v5 = vsel %vm39_vm2, %v37_v4, 0.0  ;;  %v38_v12 = vsel %vm36_vm1, 0.0, %v33_v7  ;;  %552 = vmatprep.mubr.msk.f32.mxu1 %vm461_vm7, %v214_v3  ;;  %v218_v4 = vld [vmem:[%s989_s4 + $0x8] sm:$0xff] }
  0x77   :  { %107 = vrot.lane.b32.xlu0 %v695_v5, %s624_s0  ;;  %v714_v14 = vsel %vm39_vm2, %v38_v12, 0.0 }
  0x78   :  { %v43_v6 = vpop.permute.xlu1 %42 }
  0x79   :  { %v48_v8 = vsel %vm36_vm1, 0.0, %v43_v6  ;;  %v45_v10 = vpop.permute.xlu0 %44 }
  0x7a   :  { %v50_v9 = vsel %vm39_vm2, %v48_v8, 0.0  ;;  %v49_v11 = vsel %vm36_vm1, 0.0, %v45_v10 }
  0x7b   :  { %93 = vrot.lane.b32.xlu0 %v695_v5, %s625_s24  ;;  %113 = vrot.lane.b32.xlu1 %v50_v9, %s626_s25  ;;  %v51_v13 = vsel %vm39_vm2, %v49_v11, 0.0 }
  0x7f   :  { %79 = vrot.lane.b32.xlu0 %v695_v5, %s627_s26  ;;  %99 = vrot.lane.b32.xlu1 %v50_v9, %s628_s27 }
  0x83   :  { %65 = vrot.lane.b32.xlu0 %v695_v5, %s629_s28  ;;  %85 = vrot.lane.b32.xlu1 %v50_v9, %s630_s29 }
  0x87   :  { %109 = vrot.lane.b32.xlu0 %v714_v14, %s624_s0  ;;  %115 = vrot.lane.b32.xlu1 %v51_v13, %s626_s25 }
  0x8b   :  { %95 = vrot.lane.b32.xlu0 %v714_v14, %s625_s24  ;;  %101 = vrot.lane.b32.xlu1 %v51_v13, %s628_s27 }
  0x8f   :  { %81 = vrot.lane.b32.xlu0 %v714_v14, %s627_s26  ;;  %87 = vrot.lane.b32.xlu1 %v51_v13, %s630_s29 }
  0x93   :  { %67 = vrot.lane.b32.xlu0 %v714_v14, %s629_s28  ;;  %73 = vrot.lane.b32.xlu1 %v51_v13, %s632_s7 }
  0x97   :  { %56 = vrot.lane.b32.xlu0 %v51_v13, %s633_s8  ;;  %71 = vrot.lane.b32.xlu1 %v50_v9, %s632_s7 }
  0x9b   :  { %54 = vrot.lane.b32.xlu1 %v50_v9, %s633_s8  ;;  %128 = vperm.xlu0 %620, %v27_v17  }
  0x9f   :  { %123 = vperm.xlu1 %621, %v26_v18  }
  0xe9   :  { %v108_v19 = vpop.permute.xlu0 %107 }
  0xed   :  { %v94_v20 = vpop.permute.xlu0 %93  ;;  %v114_v21 = vpop.permute.xlu1 %113 }
  0xee   :  { %v119_v29 = vsel %vm60_vm4, %v108_v19, %v114_v21 }
  0xf1   :  { %v80_v22 = vpop.permute.xlu0 %79  ;;  %v100_v23 = vpop.permute.xlu1 %99 }
  0xf2   :  { %v105_v33 = vsel %vm60_vm4, %v94_v20, %v100_v23 }
  0xf5   :  { %v66_v24 = vpop.permute.xlu0 %65  ;;  %v86_v25 = vpop.permute.xlu1 %85 }
  0xf6   :  { %v91_v37 = vsel %vm60_vm4, %v80_v22, %v86_v25 }
  0xf9   :  { %v110_v26 = vpop.permute.xlu0 %109  ;;  %v116_v27 = vpop.permute.xlu1 %115 }
  0xfa   :  { %v120_v28 = vsel %vm60_vm4, %v110_v26, %v116_v27 }
  0xfb   :  { %566 = vmatprep.subr.mxu0 %v120_v28 }
  0xfc   :  { %567 = vmatpush3.msra.mxu0 %v120_v28 }
  0xfd   :  { %v96_v30 = vpop.permute.xlu0 %95  ;;  %568 = vmatprep.subr.mxu0 %v119_v29  ;;  %v102_v31 = vpop.permute.xlu1 %101 }
  0xfe   :  { %569 = vmatpush3.msra.mxu0 %v119_v29  ;;  %v106_v32 = vsel %vm60_vm4, %v96_v30, %v102_v31 }
  0xff   :  { %570 = vmatprep.subr.mxu0 %v106_v32 }
 0x100   :  { %571 = vmatpush3.msra.mxu0 %v106_v32 }
 0x101   :  { %v82_v34 = vpop.permute.xlu0 %81  ;;  %572 = vmatprep.subr.mxu0 %v105_v33  ;;  %v88_v35 = vpop.permute.xlu1 %87 }
 0x102   :  { %573 = vmatpush3.msra.mxu0 %v105_v33  ;;  %v92_v36 = vsel %vm60_vm4, %v82_v34, %v88_v35 }
 0x103   :  { %574 = vmatprep.subr.mxu0 %v92_v36 }
 0x104   :  { %575 = vmatpush3.msra.mxu0 %v92_v36 }
 0x105   :  { %v68_v38 = vpop.permute.xlu0 %67  ;;  %576 = vmatprep.subr.mxu0 %v91_v37  ;;  %v74_v39 = vpop.permute.xlu1 %73 }
 0x106   :  { %577 = vmatpush3.msra.mxu0 %v91_v37  ;;  %v78_v40 = vsel %vm60_vm4, %v68_v38, %v74_v39 }
 0x107   :  { %578 = vmatprep.subr.mxu0 %v78_v40 }
 0x108   :  { %579 = vmatpush3.msra.mxu0 %v78_v40 }
 0x109   :  { %v57_v41 = vpop.permute.xlu0 %56  ;;  %v72_v42 = vpop.permute.xlu1 %71 }
 0x10a   :  { %v77_v43 = vsel %vm60_vm4, %v66_v24, %v72_v42  ;;  %v62_v44 = vsel %vm60_vm4, %v714_v14, %v57_v41 }
 0x10b   :  { %580 = vmatprep.subr.mxu0 %v77_v43 }
 0x10c   :  { %581 = vmatpush3.msra.mxu0 %v77_v43 }
 0x10d   :  { %582 = vmatprep.subr.mxu0 %v62_v44  ;;  %v55_v45 = vpop.permute.xlu1 %54 }
 0x10e   :  { %583 = vmatpush3.msra.mxu0 %v62_v44  ;;  %v61_v46 = vsel %vm60_vm4, %v695_v5, %v55_v45  ;;  %v217_v5 = vld [vmem:[%s989_s4] sm:$0xff] }
 0x10f   :  { %584 = vmatprep.subr.mxu0 %v61_v46 }
 0x110   :  { %585 = vmatpush3.msra.mxu0 %v61_v46 }
 0x111   :  { %587 = vmatmul.mubr.msk.f32.vlgmr.msra.gmra.mxu0 %vm131_vm3, %v25_v47 }
 0x116   :  { %v129_v48 = vpop.permute.xlu0 %128 }
 0x11a   :  { %v124_v52 = vpop.permute.xlu1 %123 }
 0x1d1   :  { %v588_v49 = vpop.f32.mrf.mxu0 }
 0x1d2   :  { %v210_v50 = vadd.f32 %v588_v49, %v129_v48 }
 0x1d3   :  { %v204_v51 = vpop.f32.mrf.mxu0 }
 0x1d4   :  { %235 = vrot.lane.b32.xlu0 %v210_v50, %s634_s14  ;;  %223 = vrot.lane.b32.xlu1 %v210_v50, %s635_s15  ;;  %v205_v53 = vadd.f32 %v204_v51, %v124_v52 }
 0x1d8   :  { %233 = vrot.lane.b32.xlu0 %v205_v53, %s634_s14  ;;  %221 = vrot.lane.b32.xlu1 %v205_v53, %s635_s15 }
 0x246   :  { %v236_v55 = vpop.permute.xlu0 %235  ;;  %v224_v56 = vpop.permute.xlu1 %223 }
 0x247   :  { %v240_v57 = vsel %vm227_vm5, 0.0, %v236_v55  ;;  %v229_v58 = vsel %vm227_vm5, 0.0, %v224_v56 }
 0x248   :  { %v242_v59 = vsel %vm230_vm6, %v240_v57, 0.0  ;;  %v766_v60 = vsel %vm230_vm6, %v229_v58, 0.0 }
 0x249   :  { %347 = vrot.lane.b32.xlu0 %v242_v59, %s637_s1  ;;  %341 = vrot.lane.b32.xlu1 %v766_v60, %s638_s16 }
 0x24a   :  { %v234_v61 = vpop.permute.xlu0 %233  ;;  %v222_v63 = vpop.permute.xlu1 %221 }
 0x24b   :  { %v239_v62 = vsel %vm227_vm5, 0.0, %v234_v61  ;;  %v228_v1 = vsel %vm227_vm5, 0.0, %v222_v63 }
 0x24c   :  { %v241_v0 = vsel %vm230_vm6, %v239_v62, 0.0  ;;  %v813_v2 = vsel %vm230_vm6, %v228_v1, 0.0 }
 0x24d   :  { %333 = vrot.lane.b32.xlu0 %v242_v59, %s639_s17  ;;  %327 = vrot.lane.b32.xlu1 %v766_v60, %s640_s18 }
 0x251   :  { %319 = vrot.lane.b32.xlu0 %v242_v59, %s641_s19  ;;  %313 = vrot.lane.b32.xlu1 %v766_v60, %s642_s20 }
 0x255   :  { %305 = vrot.lane.b32.xlu0 %v242_v59, %s626_s25  ;;  %299 = vrot.lane.b32.xlu1 %v766_v60, %s624_s0 }
 0x259   :  { %291 = vrot.lane.b32.xlu0 %v242_v59, %s628_s27  ;;  %285 = vrot.lane.b32.xlu1 %v766_v60, %s625_s24 }
 0x25d   :  { %277 = vrot.lane.b32.xlu0 %v242_v59, %s630_s29  ;;  %271 = vrot.lane.b32.xlu1 %v766_v60, %s627_s26 }
 0x261   :  { %263 = vrot.lane.b32.xlu0 %v242_v59, %s632_s7  ;;  %257 = vrot.lane.b32.xlu1 %v766_v60, %s629_s28 }
 0x265   :  { %445 = vrot.lane.b32.xlu0 %v242_v59, %s622_s22  ;;  %247 = vrot.lane.b32.xlu1 %v242_v59, %s633_s8 }
 0x269   :  { %431 = vrot.lane.b32.xlu0 %v242_v59, %s643_s21  ;;  %439 = vrot.lane.b32.xlu1 %v766_v60, %s623_s23 }
 0x26d   :  { %417 = vrot.lane.b32.xlu0 %v242_v59, %s644_s30  ;;  %425 = vrot.lane.b32.xlu1 %v766_v60, %s645_s6 }
 0x271   :  { %403 = vrot.lane.b32.xlu0 %v242_v59, %s646_s9  ;;  %411 = vrot.lane.b32.xlu1 %v766_v60, %s647_s10 }
 0x275   :  { %389 = vrot.lane.b32.xlu0 %v242_v59, %s648_s11  ;;  %397 = vrot.lane.b32.xlu1 %v766_v60, %s649_s12 }
 0x279   :  { %375 = vrot.lane.b32.xlu0 %v242_v59, %s635_s15  ;;  %383 = vrot.lane.b32.xlu1 %v766_v60, %s650_s2 }
 0x27d   :  { %345 = vrot.lane.b32.xlu0 %v241_v0, %s637_s1  ;;  %369 = vrot.lane.b32.xlu1 %v766_v60, %s634_s14 }
 0x281   :  { %331 = vrot.lane.b32.xlu0 %v241_v0, %s639_s17  ;;  %339 = vrot.lane.b32.xlu1 %v813_v2, %s638_s16 }
 0x285   :  { %317 = vrot.lane.b32.xlu0 %v241_v0, %s641_s19  ;;  %325 = vrot.lane.b32.xlu1 %v813_v2, %s640_s18 }
 0x289   :  { %303 = vrot.lane.b32.xlu0 %v241_v0, %s626_s25  ;;  %311 = vrot.lane.b32.xlu1 %v813_v2, %s642_s20  ;;  %s652_s25 = smov 120  }
 0x28d   :  { %289 = vrot.lane.b32.xlu0 %v241_v0, %s628_s27  ;;  %297 = vrot.lane.b32.xlu1 %v813_v2, %s624_s0 }
 0x291   :  { %275 = vrot.lane.b32.xlu0 %v241_v0, %s630_s29  ;;  %283 = vrot.lane.b32.xlu1 %v813_v2, %s625_s24 }
 0x295   :  { %361 = vrot.lane.b32.xlu0 %v242_v59, %s651_s13  ;;  %269 = vrot.lane.b32.xlu1 %v813_v2, %s627_s26 }
 0x299   :  { %261 = vrot.lane.b32.xlu0 %v241_v0, %s632_s7  ;;  %255 = vrot.lane.b32.xlu1 %v813_v2, %s629_s28 }
 0x29d   :  { %245 = vrot.lane.b32.xlu0 %v241_v0, %s633_s8  ;;  %355 = vrot.lane.b32.xlu1 %v766_v60, %s652_s25 }
 0x2a1   :  { %443 = vrot.lane.b32.xlu0 %v241_v0, %s622_s22  ;;  %437 = vrot.lane.b32.xlu1 %v813_v2, %s623_s23 }
 0x2a5   :  { %429 = vrot.lane.b32.xlu0 %v241_v0, %s643_s21  ;;  %423 = vrot.lane.b32.xlu1 %v813_v2, %s645_s6 }
 0x2a9   :  { %415 = vrot.lane.b32.xlu0 %v241_v0, %s644_s30  ;;  %409 = vrot.lane.b32.xlu1 %v813_v2, %s647_s10 }
 0x2ad   :  { %401 = vrot.lane.b32.xlu0 %v241_v0, %s646_s9  ;;  %395 = vrot.lane.b32.xlu1 %v813_v2, %s649_s12 }
 0x2b1   :  { %387 = vrot.lane.b32.xlu0 %v241_v0, %s648_s11  ;;  %381 = vrot.lane.b32.xlu1 %v813_v2, %s650_s2 }
 0x2b5   :  { %373 = vrot.lane.b32.xlu0 %v241_v0, %s635_s15  ;;  %367 = vrot.lane.b32.xlu1 %v813_v2, %s634_s14 }
 0x2b9   :  { %359 = vrot.lane.b32.xlu0 %v241_v0, %s651_s13  ;;  %353 = vrot.lane.b32.xlu1 %v813_v2, %s652_s25 }
 0x2bb   :  { %v348_v6 = vpop.permute.xlu0 %347  ;;  %v342_v7 = vpop.permute.xlu1 %341 }
 0x2bc   :  { %v352_v8 = vsel %vm60_vm4, %v342_v7, %v348_v6 }
 0x2bd   :  { %458 = vperm.xlu0 %620, %v218_v4   ;;  %453 = vperm.xlu1 %621, %v217_v5  }
 0x2be   :  { %469 = vmatpush1.msra.mxu1 %v352_v8 }
 0x2bf   :  { %v334_v9 = vpop.permute.xlu0 %333  ;;  %v328_v10 = vpop.permute.xlu1 %327  ;;  %470 = vmatprep.subr.mxu1 %v636_v54 }
 0x2c0   :  { %v338_v38 = vsel %vm60_vm4, %v328_v10, %v334_v9 }
 0x2c3   :  { %v320_v11 = vpop.permute.xlu0 %319  ;;  %v314_v12 = vpop.permute.xlu1 %313 }
 0x2c4   :  { %v324_v42 = vsel %vm60_vm4, %v314_v12, %v320_v11 }
 0x2c7   :  { %v306_v13 = vpop.permute.xlu0 %305  ;;  %v300_v14 = vpop.permute.xlu1 %299 }
 0x2c8   :  { %v310_v46 = vsel %vm60_vm4, %v300_v14, %v306_v13 }
 0x2cb   :  { %v292_v15 = vpop.permute.xlu0 %291  ;;  %v286_v16 = vpop.permute.xlu1 %285 }
 0x2cc   :  { %v296_v50 = vsel %vm60_vm4, %v286_v16, %v292_v15 }
 0x2cf   :  { %v278_v17 = vpop.permute.xlu0 %277  ;;  %v272_v18 = vpop.permute.xlu1 %271 }
 0x2d0   :  { %v282_v55 = vsel %vm60_vm4, %v272_v18, %v278_v17 }
 0x2d3   :  { %v264_v19 = vpop.permute.xlu0 %263  ;;  %v258_v20 = vpop.permute.xlu1 %257 }
 0x2d4   :  { %v268_v59 = vsel %vm60_vm4, %v258_v20, %v264_v19 }
 0x2d7   :  { %v868_v21 = vpop.permute.xlu0 %445  ;;  %v870_v22 = vpop.permute.xlu1 %247 }
 0x2d8   :  { %v252_v0 = vsel %vm60_vm4, %v766_v60, %v870_v22 }
 0x2db   :  { %v872_v23 = vpop.permute.xlu0 %431  ;;  %v874_v24 = vpop.permute.xlu1 %439 }
 0x2dc   :  { %v450_v5 = vsel %vm60_vm4, %v874_v24, %v868_v21 }
 0x2df   :  { %v876_v25 = vpop.permute.xlu0 %417  ;;  %v878_v26 = vpop.permute.xlu1 %425 }
 0x2e3   :  { %v880_v27 = vpop.permute.xlu0 %403  ;;  %v882_v28 = vpop.permute.xlu1 %411 }
 0x2e4   :  { %v422_v11 = vsel %vm60_vm4, %v882_v28, %v876_v25 }
 0x2e7   :  { %v884_v29 = vpop.permute.xlu0 %389  ;;  %v886_v30 = vpop.permute.xlu1 %397 }
 0x2e8   :  { %v408_v15 = vsel %vm60_vm4, %v886_v30, %v880_v27  ;;  %v213_v30 = vld [vmem:[%s988_s3] sm:$0xff] }
 0x2eb   :  { %v888_v31 = vpop.permute.xlu0 %375  ;;  %v890_v32 = vpop.permute.xlu1 %383 }
 0x2ec   :  { %v394_v19 = vsel %vm60_vm4, %v890_v32, %v884_v29  ;;  %v216_v32 = vld [vmem:[%s988_s3 + $0x18] sm:$0xff] }
 0x2ef   :  { %v346_v33 = vpop.permute.xlu0 %345  ;;  %v892_v34 = vpop.permute.xlu1 %369 }
 0x2f3   :  { %v332_v35 = vpop.permute.xlu0 %331  ;;  %v340_v36 = vpop.permute.xlu1 %339 }
 0x2f4   :  { %v351_v37 = vsel %vm60_vm4, %v340_v36, %v346_v33  ;;  %v215_v33 = vld [vmem:[%s988_s3 + $0x10] sm:$0xff] }
 0x2f5   :  { %471 = vmatpush1.msra.mxu1 %v351_v37 }
 0x2f6   :  { %472 = vmatprep.subr.mxu1 %v636_v54 }
 0x2f7   :  { %v318_v39 = vpop.permute.xlu0 %317  ;;  %473 = vmatpush1.msra.mxu1 %v338_v38  ;;  %v326_v40 = vpop.permute.xlu1 %325 }
 0x2f8   :  { %474 = vmatprep.subr.mxu1 %v636_v54  ;;  %v337_v41 = vsel %vm60_vm4, %v326_v40, %v332_v35 }
 0x2f9   :  { %475 = vmatpush1.msra.mxu1 %v337_v41 }
 0x2fa   :  { %476 = vmatprep.subr.mxu1 %v636_v54 }
 0x2fb   :  { %v304_v43 = vpop.permute.xlu0 %303  ;;  %477 = vmatpush1.msra.mxu1 %v324_v42  ;;  %v312_v44 = vpop.permute.xlu1 %311 }
 0x2fc   :  { %478 = vmatprep.subr.mxu1 %v636_v54  ;;  %v323_v45 = vsel %vm60_vm4, %v312_v44, %v318_v39 }
 0x2fd   :  { %479 = vmatpush1.msra.mxu1 %v323_v45 }
 0x2fe   :  { %480 = vmatprep.subr.mxu1 %v636_v54 }
 0x2ff   :  { %v290_v47 = vpop.permute.xlu0 %289  ;;  %481 = vmatpush1.msra.mxu1 %v310_v46  ;;  %v298_v48 = vpop.permute.xlu1 %297 }
 0x300   :  { %482 = vmatprep.subr.mxu1 %v636_v54  ;;  %v309_v49 = vsel %vm60_vm4, %v298_v48, %v304_v43 }
 0x301   :  { %483 = vmatpush1.msra.mxu1 %v309_v49 }
 0x302   :  { %484 = vmatprep.subr.mxu1 %v636_v54 }
 0x303   :  { %v276_v51 = vpop.permute.xlu0 %275  ;;  %485 = vmatpush1.msra.mxu1 %v296_v50  ;;  %v284_v52 = vpop.permute.xlu1 %283 }
 0x304   :  { %486 = vmatprep.subr.mxu1 %v636_v54  ;;  %v295_v53 = vsel %vm60_vm4, %v284_v52, %v290_v47 }
 0x305   :  { %487 = vmatpush1.msra.mxu1 %v295_v53 }
 0x306   :  { %488 = vmatprep.subr.mxu1 %v636_v54 }
 0x307   :  { %v913_v56 = vpop.permute.xlu0 %361  ;;  %489 = vmatpush1.msra.mxu1 %v282_v55  ;;  %v270_v57 = vpop.permute.xlu1 %269 }
 0x308   :  { %490 = vmatprep.subr.mxu1 %v636_v54  ;;  %v281_v58 = vsel %vm60_vm4, %v270_v57, %v276_v51 }
 0x309   :  { %491 = vmatpush1.msra.mxu1 %v281_v58 }
 0x30a   :  { %492 = vmatprep.subr.mxu1 %v636_v54 }
 0x30b   :  { %v262_v61 = vpop.permute.xlu0 %261  ;;  %493 = vmatpush1.msra.mxu1 %v268_v59  ;;  %v256_v62 = vpop.permute.xlu1 %255 }
 0x30c   :  { %494 = vmatprep.subr.mxu1 %v636_v54  ;;  %v267_v63 = vsel %vm60_vm4, %v256_v62, %v262_v61 }
 0x30d   :  { %495 = vmatpush1.msra.mxu1 %v267_v63 }
 0x30e   :  { %496 = vmatprep.subr.mxu1 %v636_v54 }
 0x30f   :  { %v246_v1 = vpop.permute.xlu0 %245  ;;  %497 = vmatpush1.msra.mxu1 %v252_v0  ;;  %v356_v3 = vpop.permute.xlu1 %355 }
 0x310   :  { %498 = vmatprep.subr.mxu1 %v636_v54  ;;  %v251_v4 = vsel %vm60_vm4, %v813_v2, %v246_v1  ;;  %v436_v2 = vsel %vm60_vm4, %v878_v26, %v872_v23  ;;  %v380_v23 = vsel %vm60_vm4, %v892_v34, %v888_v31  ;;  %v366_v27 = vsel %vm60_vm4, %v356_v3, %v913_v56 }
 0x311   :  { %499 = vmatpush1.msra.mxu1 %v251_v4 }
 0x312   :  { %504 = vmatprep.subr.mxu1 %v636_v54 }
 0x313   :  { %v444_v6 = vpop.permute.xlu0 %443  ;;  %505 = vmatpush2.msra.mxu1 %v450_v5  ;;  %v438_v7 = vpop.permute.xlu1 %437 }
 0x314   :  { %506 = vmatprep.subr.mxu1 %v636_v54  ;;  %v449_v60 = vsel %vm60_vm4, %v438_v7, %v444_v6 }
 0x315   :  { %507 = vmatpush2.msra.mxu1 %v449_v60 }
 0x316   :  { %508 = vmatprep.subr.mxu1 %v636_v54 }
 0x317   :  { %v430_v8 = vpop.permute.xlu0 %429  ;;  %509 = vmatpush2.msra.mxu1 %v436_v2  ;;  %v424_v9 = vpop.permute.xlu1 %423 }
 0x318   :  { %510 = vmatprep.subr.mxu1 %v636_v54  ;;  %v435_v10 = vsel %vm60_vm4, %v424_v9, %v430_v8 }
 0x319   :  { %511 = vmatpush2.msra.mxu1 %v435_v10 }
 0x31a   :  { %512 = vmatprep.subr.mxu1 %v636_v54 }
 0x31b   :  { %v416_v12 = vpop.permute.xlu0 %415  ;;  %513 = vmatpush2.msra.mxu1 %v422_v11  ;;  %v410_v13 = vpop.permute.xlu1 %409 }
 0x31c   :  { %514 = vmatprep.subr.mxu1 %v636_v54  ;;  %v421_v14 = vsel %vm60_vm4, %v410_v13, %v416_v12 }
 0x31d   :  { %515 = vmatpush2.msra.mxu1 %v421_v14 }
 0x31e   :  { %516 = vmatprep.subr.mxu1 %v636_v54 }
 0x31f   :  { %v402_v16 = vpop.permute.xlu0 %401  ;;  %517 = vmatpush2.msra.mxu1 %v408_v15  ;;  %v396_v17 = vpop.permute.xlu1 %395 }
 0x320   :  { %518 = vmatprep.subr.mxu1 %v636_v54  ;;  %v407_v18 = vsel %vm60_vm4, %v396_v17, %v402_v16 }
 0x321   :  { %519 = vmatpush2.msra.mxu1 %v407_v18 }
 0x322   :  { %520 = vmatprep.subr.mxu1 %v636_v54 }
 0x323   :  { %v388_v20 = vpop.permute.xlu0 %387  ;;  %521 = vmatpush2.msra.mxu1 %v394_v19  ;;  %v382_v21 = vpop.permute.xlu1 %381 }
 0x324   :  { %522 = vmatprep.subr.mxu1 %v636_v54  ;;  %v393_v22 = vsel %vm60_vm4, %v382_v21, %v388_v20 }
 0x325   :  { %523 = vmatpush2.msra.mxu1 %v393_v22 }
 0x326   :  { %524 = vmatprep.subr.mxu1 %v636_v54 }
 0x327   :  { %v374_v24 = vpop.permute.xlu0 %373  ;;  %525 = vmatpush2.msra.mxu1 %v380_v23  ;;  %v368_v25 = vpop.permute.xlu1 %367 }
 0x328   :  { %526 = vmatprep.subr.mxu1 %v636_v54  ;;  %v379_v26 = vsel %vm60_vm4, %v368_v25, %v374_v24 }
 0x329   :  { %527 = vmatpush2.msra.mxu1 %v379_v26 }
 0x32a   :  { %528 = vmatprep.subr.mxu1 %v636_v54 }
 0x32b   :  { %v360_v28 = vpop.permute.xlu0 %359  ;;  %529 = vmatpush2.msra.mxu1 %v366_v27  ;;  %v354_v29 = vpop.permute.xlu1 %353 }
 0x32c   :  { %530 = vmatprep.subr.mxu1 %v636_v54  ;;  %v365_v31 = vsel %vm60_vm4, %v354_v29, %v360_v28 }
 0x32d   :  { %531 = vmatpush2.msra.mxu1 %v365_v31 }
 0x32e   :  { %533 = vmatmul.mubr.f32.vlgmr.msra.gmra.mxu1 %v213_v30 }
 0x32f   :  { %553 = vmatprep.mubr.msk.f32.mxu1 %vm461_vm7, %v216_v32 }
 0x332   :  { %538 = vmatmul.mubr.f32.gmra.mxu1 %v215_v33 }
 0x338   :  { %v454_v34 = vpop.permute.xlu1 %453  ;;  %v459_v37 = vpop.permute.xlu0 %458 }
 0x3ee   :  { %v534_v35 = vpop.f32.mrf.mxu1 }
 0x3ef   :  { %v535_v36 = vadd.f32 %v534_v35, %v454_v34 }
 0x3f0   :  { %v536_v54 = vpop.f32.mrf.mxu1 }
 0x3f1   :  { %544 = vst.msk [vmem:[%s990_s5] sm:$0xff] %vm543_vm8, %v535_v36 }
 0x3f2   :  { %v539_v38 = vpop.f32.mrf.mxu1 }
 0x3f3   :  { %v540_v39 = vadd.f32 %v539_v38, %v459_v37 }
 0x3f4   :  { %v541_v40 = vpop.f32.mrf.mxu1 }
 0x3f5   :  { %545 = vst.msk [vmem:[%s990_s5 + $0x8] sm:$0xff] %vm543_vm8, %v540_v39 }

</bundles_post_ra>
